<compile_context>
chip_gen: v5e
topology: v5e:2x2
jax: 0.10.0
libtpu: 0.0.40
codegen_flags: <defaults>
</compile_context>

<pallas_src>
import jax
import jax.numpy as jnp
from jax.experimental import pallas as pl
from jax.experimental.pallas import tpu as pltpu


def _round_up(n, m):
    return ((n + m - 1) // m) * m


def fcnn_kernel(x_ref, w1_ref, b1_ref, w2_ref, b2_ref, w3_ref, b3_ref, out_ref):
    # Layer 1: Linear + ReLU (Dropout = identity in eval mode).
    # x may arrive as f32 (no-pad fast path) or bf16 (padded path); cast to the
    # weight dtype on the VPU — the kernel is HBM-bound, so the cast is free.
    x = x_ref[...].astype(w1_ref.dtype)
    h = jnp.dot(x, w1_ref[...], preferred_element_type=jnp.float32)
    h = jnp.maximum(h + b1_ref[...], 0.0)
    # Layer 2: Linear + ReLU (Dropout = identity in eval mode).
    h = jnp.dot(h.astype(w2_ref.dtype), w2_ref[...],
                preferred_element_type=jnp.float32)
    h = jnp.maximum(h + b2_ref[...], 0.0)
    # Output layer: Linear (no activation); cast to bf16 only at the store.
    o = jnp.dot(h.astype(w3_ref.dtype), w3_ref[...],
                preferred_element_type=jnp.float32)
    out_ref[...] = (o + b3_ref[...]).astype(out_ref.dtype)
    # TODO(synk): training-mode Dropout (pltpu.prng_seed / prng_random_bits
    # stochastic masking) omitted; eval-mode semantics implemented.
    # Note: if bundle dumps at TM>=512 ever show vld/vst slot saturation from
    # the [TM,128] f32 intermediate, sub-tile the batch inside this body with a
    # short unrolled lax.fori_loop over 128-256-row chunks (keep the big DMA
    # block unchanged).


def custom_fcnn_forward(x, params, *, tm=1024, compute_dtype=jnp.bfloat16,
                        out_dtype=jnp.bfloat16):
    """x: (B, C, H, W) NCHW input. Weights pre-transposed to (in, out)."""
    w1, b1, w2, b2, w3, b3 = params
    B = x.shape[0]
    in_dim, hid = w1.shape
    out_dim = w3.shape[1]

    # Lane-dense padding (exact: zero weight columns + zero bias -> ReLU gives
    # 0, and the matching zero weight rows contribute nothing downstream).
    in_p = _round_up(in_dim, 128)
    hid_p = _round_up(hid, 128)
    out_p = _round_up(out_dim, 128)

    # --- Batch tiling --------------------------------------------------------
    # Large tiles amortize the ~0.35us per-step overhead; keep >=2 grid steps
    # at larger B so the "parallel" axis can use both v7x TensorCores.
    min_tiles = 2 if B >= 512 else 1
    n_tiles = max(min_tiles, pl.cdiv(B, tm))
    TM = _round_up(pl.cdiv(B, n_tiles), 16)   # multiple of 16: bf16 sublanes
    B_p = _round_up(B, TM)
    grid = (B_p // TM,)

    # --- Input: avoid an extra HBM pass over x ------------------------------
    # nn.Flatten is a free reshape.  No padding needed -> hand x straight to
    # the kernel in its native dtype (single HBM read; in-kernel bf16 cast).
    # Padding needed -> materialize the padded copy directly as bf16.
    x2d = x.reshape(B, -1)
    if B_p != B or in_p != in_dim:
        x_in = jnp.pad(x2d.astype(compute_dtype),
                       ((0, B_p - B), (0, in_p - in_dim)))
    else:
        x_in = x2d

    def pad2(a, rows, cols, dt):
        return jnp.zeros((rows, cols), dt).at[:a.shape[0], :a.shape[1]].set(
            a.astype(dt))

    w1p = pad2(w1, in_p, hid_p, compute_dtype)
    w2p = pad2(w2, hid_p, hid_p, compute_dtype)
    w3p = pad2(w3, hid_p, out_p, compute_dtype)
    b1p = pad2(b1, 1, hid_p, jnp.float32)
    b2p = pad2(b2, 1, hid_p, jnp.float32)
    b3p = pad2(b3, 1, out_p, jnp.float32)

    # Constant index_map -> VMEM-resident across the whole grid (never
    # re-DMA'd); Buffered(1) avoids allocating a useless second buffer.
    def resident(shape):
        return pl.BlockSpec(shape, lambda i: (0, 0),
                            pipeline_mode=pl.Buffered(1))

    flops = 2 * B_p * (in_p * hid_p + hid_p * hid_p + hid_p * out_p)
    bytes_accessed = int(
        x_in.size * x_in.dtype.itemsize
        + sum(a.size * a.dtype.itemsize for a in (w1p, b1p, w2p, b2p, w3p, b3p))
        + B_p * out_p * jnp.dtype(out_dtype).itemsize)

    out_padded = pl.pallas_call(
        fcnn_kernel,
        out_shape=jax.ShapeDtypeStruct((B_p, out_p), out_dtype),
        grid=grid,
        in_specs=[
            pl.BlockSpec((TM, in_p), lambda i: (i, 0)),   # x: streamed tiles
            resident((in_p, hid_p)),                      # w1: VMEM-resident
            resident((1, hid_p)),                         # b1
            resident((hid_p, hid_p)),                     # w2
            resident((1, hid_p)),                         # b2
            resident((hid_p, out_p)),                     # w3
            resident((1, out_p)),                         # b3
        ],
        out_specs=pl.BlockSpec((TM, out_p), lambda i: (i, 0)),
        compiler_params=pltpu.CompilerParams(
            dimension_semantics=("parallel",)),
        cost_estimate=pl.CostEstimate(
            flops=flops, transcendentals=0, bytes_accessed=bytes_accessed),
    )(x_in, w1p, b1p, w2p, b2p, w3p, b3p)

    # Padded batch rows hold ReLU(bias) garbage and lanes >= out_dim are zero;
    # this slice is what makes the padding mathematically exact — keep it.
    return out_padded[:B, :out_dim]


def init_params(key, input_dim, hidden_dim, output_dim):
    """Deterministic init mimicking nn.Linear default (uniform +/- 1/sqrt(fan_in)).
    Weights are stored as (in_features, out_features)."""
    ks = jax.random.split(key, 6)

    def linear(kw, kb, fan_in, fan_out):
        bound = 1.0 / jnp.sqrt(fan_in)
        w = jax.random.uniform(kw, (fan_in, fan_out), jnp.float32, -bound, bound)
        b = jax.random.uniform(kb, (1, fan_out), jnp.float32, -bound, bound)
        return w, b

    w1, b1 = linear(ks[0], ks[1], input_dim, hidden_dim)
    w2, b2 = linear(ks[2], ks[3], hidden_dim, hidden_dim)
    w3, b3 = linear(ks[4], ks[5], hidden_dim, output_dim)
    return (w1, b1, w2, b2, w3, b3)


def reference_forward(x, params, compute_dtype=jnp.float32):
    """Pure-JAX reference. compute_dtype=bf16 matches the kernel's MXU numerics."""
    w1, b1, w2, b2, w3, b3 = params
    c = lambda a: a.astype(compute_dtype)
    h = x.reshape(x.shape[0], -1).astype(jnp.float32)
    h = jnp.maximum(
        jnp.dot(c(h), c(w1), preferred_element_type=jnp.float32) + b1, 0.0)
    h = jnp.maximum(
        jnp.dot(c(h), c(w2), preferred_element_type=jnp.float32) + b2, 0.0)
    return jnp.dot(c(h), c(w3), preferred_element_type=jnp.float32) + b3


if __name__ == "__main__":
    # CustomFCNN(input_dim=4*16*16, hidden_layer_dims=(2, 32), output_dim=10)
    # -> num_layers=2, hidden_dim=32: 1024 -> 32 -> 32 -> 10.
    B, C, H, W = 2, 4, 16, 16
    input_dim = C * H * W          # flatten -> 1024 features
    hidden_dim = 32
    output_dim = 10

    key = jax.random.PRNGKey(0)
    kx, kp, kx2 = jax.random.split(key, 3)
    params = init_params(kp, input_dim, hidden_dim, output_dim)

    # --- Case 1: tiny batch (exercises the padded-bf16 input path). ---------
    x = jax.random.normal(kx, (B, C, H, W), dtype=jnp.float32)
    out = jax.block_until_ready(custom_fcnn_forward(x, params))
    assert out.shape == (B, output_dim), out.shape
    out_f32 = out.astype(jnp.float32)

    # Tight check vs a reference using the same bf16 matmul numerics
    # (tolerance allows for the final bf16 logit rounding of the kernel output).
    ref_bf16 = reference_forward(x, params, compute_dtype=jnp.bfloat16)
    assert jnp.allclose(out_f32, ref_bf16, atol=5e-3, rtol=1e-2), "mismatch (bf16 ref)"

    # Loose check vs the full-f32 reference (bf16 quantization error only).
    ref_f32 = reference_forward(x, params, compute_dtype=jnp.float32)
    assert jnp.allclose(out_f32, ref_f32, atol=5e-2, rtol=5e-2), "mismatch (f32 ref)"

    # --- Case 2: batch equal to a full tile (exercises the zero-copy f32 path).
    B2 = 32
    x2 = jax.random.normal(kx2, (B2, C, H, W), dtype=jnp.float32)
    out2 = jax.block_until_ready(custom_fcnn_forward(x2, params))
    assert out2.shape == (B2, output_dim), out2.shape
    ref2 = reference_forward(x2, params, compute_dtype=jnp.bfloat16)
    assert jnp.allclose(out2.astype(jnp.float32), ref2, atol=5e-3, rtol=1e-2), \
        "mismatch (bf16 ref, no-pad path)"

    print("KERNEL_OK")
</pallas_src>

<mosaic_0001>
module attributes {stable_mosaic.version = 11 : i64} {
  func.func @fcnn_kernel(%arg0: i32, %arg1: memref<16x1024xbf16, #tpu.memory_space<vmem>>, %arg2: memref<1024x128xbf16, #tpu.memory_space<vmem>>, %arg3: memref<1x128xf32, #tpu.memory_space<vmem>>, %arg4: memref<128x128xbf16, #tpu.memory_space<vmem>>, %arg5: memref<1x128xf32, #tpu.memory_space<vmem>>, %arg6: memref<128x128xbf16, #tpu.memory_space<vmem>>, %arg7: memref<1x128xf32, #tpu.memory_space<vmem>>, %arg8: memref<16x128xbf16, #tpu.memory_space<vmem>>) attributes {dimension_semantics = [#tpu.dimension_semantics<parallel>], iteration_bounds = array<i64: 1>, scalar_prefetch = 0 : i64, scratch_operands = 0 : i64, tpu.core_type = #tpu.core_type<tc>, window_params = [{transform_indices = @transform_0, window_bounds = array<i64: 16, 1024>}, {pipeline_mode = #tpu.pipeline_mode<synchronous>, transform_indices = @transform_1, window_bounds = array<i64: 1024, 128>}, {pipeline_mode = #tpu.pipeline_mode<synchronous>, transform_indices = @transform_2, window_bounds = array<i64: 1, 128>}, {pipeline_mode = #tpu.pipeline_mode<synchronous>, transform_indices = @transform_3, window_bounds = array<i64: 128, 128>}, {pipeline_mode = #tpu.pipeline_mode<synchronous>, transform_indices = @transform_4, window_bounds = array<i64: 1, 128>}, {pipeline_mode = #tpu.pipeline_mode<synchronous>, transform_indices = @transform_5, window_bounds = array<i64: 128, 128>}, {pipeline_mode = #tpu.pipeline_mode<synchronous>, transform_indices = @transform_6, window_bounds = array<i64: 1, 128>}, {transform_indices = @transform_7, window_bounds = array<i64: 16, 128>}]} {
    %c0 = arith.constant 0 : index
    %c0_0 = arith.constant 0 : index
    %0 = vector.load %arg1[%c0, %c0_0] : memref<16x1024xbf16, #tpu.memory_space<vmem>>, vector<16x1024xbf16>
    %c0_1 = arith.constant 0 : index
    %c0_2 = arith.constant 0 : index
    %1 = vector.load %arg2[%c0_1, %c0_2] : memref<1024x128xbf16, #tpu.memory_space<vmem>>, vector<1024x128xbf16>
    %cst = arith.constant dense<0.000000e+00> : vector<16x128xf32>
    %2 = tpu.matmul %0, %1, %cst {dimension_numbers = #tpu.dot_dimension_numbers<[1], [0], [0], [1], [0, 0, 1, 1], [], []>} : vector<16x1024xbf16>, vector<1024x128xbf16>, vector<16x128xf32> -> vector<16x128xf32>
    %c0_3 = arith.constant 0 : index
    %c0_4 = arith.constant 0 : index
    %3 = vector.load %arg3[%c0_3, %c0_4] : memref<1x128xf32, #tpu.memory_space<vmem>>, vector<1x128xf32>
    %4 = vector.broadcast %3 : vector<1x128xf32> to vector<16x128xf32>
    %5 = arith.addf %2, %4 : vector<16x128xf32>
    %cst_5 = arith.constant 0.000000e+00 : f32
    %6 = vector.broadcast %cst_5 : f32 to vector<16x128xf32>
    %7 = arith.maximumf %5, %6 : vector<16x128xf32>
    %8 = arith.truncf %7 : vector<16x128xf32> to vector<16x128xbf16>
    %c0_6 = arith.constant 0 : index
    %c0_7 = arith.constant 0 : index
    %9 = vector.load %arg4[%c0_6, %c0_7] : memref<128x128xbf16, #tpu.memory_space<vmem>>, vector<128x128xbf16>
    %cst_8 = arith.constant dense<0.000000e+00> : vector<16x128xf32>
    %10 = tpu.matmul %8, %9, %cst_8 {dimension_numbers = #tpu.dot_dimension_numbers<[1], [0], [0], [1], [0, 0, 1, 1], [], []>} : vector<16x128xbf16>, vector<128x128xbf16>, vector<16x128xf32> -> vector<16x128xf32>
    %c0_9 = arith.constant 0 : index
    %c0_10 = arith.constant 0 : index
    %11 = vector.load %arg5[%c0_9, %c0_10] : memref<1x128xf32, #tpu.memory_space<vmem>>, vector<1x128xf32>
    %12 = vector.broadcast %11 : vector<1x128xf32> to vector<16x128xf32>
    %13 = arith.addf %10, %12 : vector<16x128xf32>
    %cst_11 = arith.constant 0.000000e+00 : f32
    %14 = vector.broadcast %cst_11 : f32 to vector<16x128xf32>
    %15 = arith.maximumf %13, %14 : vector<16x128xf32>
    %16 = arith.truncf %15 : vector<16x128xf32> to vector<16x128xbf16>
    %c0_12 = arith.constant 0 : index
    %c0_13 = arith.constant 0 : index
    %17 = vector.load %arg6[%c0_12, %c0_13] : memref<128x128xbf16, #tpu.memory_space<vmem>>, vector<128x128xbf16>
    %cst_14 = arith.constant dense<0.000000e+00> : vector<16x128xf32>
    %18 = tpu.matmul %16, %17, %cst_14 {dimension_numbers = #tpu.dot_dimension_numbers<[1], [0], [0], [1], [0, 0, 1, 1], [], []>} : vector<16x128xbf16>, vector<128x128xbf16>, vector<16x128xf32> -> vector<16x128xf32>
    %c0_15 = arith.constant 0 : index
    %c0_16 = arith.constant 0 : index
    %19 = vector.load %arg7[%c0_15, %c0_16] : memref<1x128xf32, #tpu.memory_space<vmem>>, vector<1x128xf32>
    %20 = vector.broadcast %19 : vector<1x128xf32> to vector<16x128xf32>
    %21 = arith.addf %18, %20 : vector<16x128xf32>
    %22 = arith.truncf %21 : vector<16x128xf32> to vector<16x128xbf16>
    %c0_17 = arith.constant 0 : index
    %c0_18 = arith.constant 0 : index
    %23 = vector.load %arg8[%c0_17, %c0_18] : memref<16x128xbf16, #tpu.memory_space<vmem>>, vector<16x128xbf16>
    tpu.vector_store %arg8[%c0_17, %c0_18], %22 {strides = array<i32>} : memref<16x128xbf16, #tpu.memory_space<vmem>>, vector<16x128xbf16>,
    return
  }
  func.func @transform_0(%arg0: i32) -> (i32, i32) {
    %c0_i32 = arith.constant 0 : i32
    %c0_i32_0 = arith.constant 0 : i32
    return %arg0, %c0_i32 : i32, i32
  }
  func.func @transform_1(%arg0: i32) -> (i32, i32) {
    %c0_i32 = arith.constant 0 : i32
    %c0_i32_0 = arith.constant 0 : i32
    %c0_i32_1 = arith.constant 0 : i32
    return %c0_i32, %c0_i32_0 : i32, i32
  }
  func.func @transform_2(%arg0: i32) -> (i32, i32) {
    %c0_i32 = arith.constant 0 : i32
    %c0_i32_0 = arith.constant 0 : i32
    %c0_i32_1 = arith.constant 0 : i32
    return %c0_i32, %c0_i32_0 : i32, i32
  }
  func.func @transform_3(%arg0: i32) -> (i32, i32) {
    %c0_i32 = arith.constant 0 : i32
    %c0_i32_0 = arith.constant 0 : i32
    %c0_i32_1 = arith.constant 0 : i32
    return %c0_i32, %c0_i32_0 : i32, i32
  }
  func.func @transform_4(%arg0: i32) -> (i32, i32) {
    %c0_i32 = arith.constant 0 : i32
    %c0_i32_0 = arith.constant 0 : i32
    %c0_i32_1 = arith.constant 0 : i32
    return %c0_i32, %c0_i32_0 : i32, i32
  }
  func.func @transform_5(%arg0: i32) -> (i32, i32) {
    %c0_i32 = arith.constant 0 : i32
    %c0_i32_0 = arith.constant 0 : i32
    %c0_i32_1 = arith.constant 0 : i32
    return %c0_i32, %c0_i32_0 : i32, i32
  }
  func.func @transform_6(%arg0: i32) -> (i32, i32) {
    %c0_i32 = arith.constant 0 : i32
    %c0_i32_0 = arith.constant 0 : i32
    %c0_i32_1 = arith.constant 0 : i32
    return %c0_i32, %c0_i32_0 : i32, i32
  }
  func.func @transform_7(%arg0: i32) -> (i32, i32) {
    %c0_i32 = arith.constant 0 : i32
    %c0_i32_0 = arith.constant 0 : i32
    return %arg0, %c0_i32 : i32, i32
  }
}

</mosaic_0001>

<bundles_post_ra>
// kernel: tpu_custom_call.1
= control target key start
LH: loop header
LB: loop body
LE: loop exit
PB: predicated region body
PF: predicated region fallthrough
CT: control target
= control target key end

     0   :  { %12 = vsyncpa [#allocation3], 0  ;;  %s1631_s0 = inlined_call_operand.hbm [shape: bf16[16,1024], index: 0, kind: input, shape index: {}]   ;;  %s1632_s1 = inlined_call_operand.hbm [shape: bf16[1024,128], index: 1, kind: input, shape index: {}]   ;;  %s1633_s2 = inlined_call_operand.vmem [shape: f32[1,128], index: 2, kind: input, shape index: {}]   ;;  %s1634_s3 = inlined_call_operand.hbm [shape: bf16[128,128], index: 3, kind: input, shape index: {}]   ;;  %s1635_s4 = inlined_call_operand.vmem [shape: f32[1,128], index: 4, kind: input, shape index: {}]   ;;  %s1636_s5 = inlined_call_operand.hbm [shape: bf16[128,128], index: 5, kind: input, shape index: {}]   ;;  %s1637_s6 = inlined_call_operand.vmem [shape: f32[1,128], index: 6, kind: input, shape index: {}]   ;;  %s1638_s7 = inlined_call_operand.hbm [shape: bf16[16,128], index: 7, kind: output, shape index: {}]  }
   0x1   :  { %13 = vsyncpa [#allocation6], 0 }
   0x2   :  { %14 = vsyncpa [#allocation9], 0  ;;  %s33_s26 = sshll.u32 %s1632_s1, 4  ;;  %s34_s26 = int_to_ptr.hbm [resolvable:$true] %s33_s26 }
   0x3   :  { %15 = vsyncpa [#allocation4], 0  ;;  %s1546_s27 = smov [#allocation5]   ;;  %s20_s8 = sshll.u32 %s1631_s0, 4  ;;  %s21_s8 = int_to_ptr.hbm [resolvable:$true] %s20_s8 }
   0x4   :  { %s35_s28 = sshll.u32 %s1546_s27, 4  ;;  %s1547_s9 = smov 64   ;;  %s36_s28 = int_to_ptr.vmem [resolvable:$true] %s35_s28 }
   0x5   :  { %s1548_s10 = smov 4   ;;  %s1549_s11 = smov [#allocation2]  }
   0x6   :  { %41 = dma.hbm_to_vmem [thread:$0]  %s34_s26, 8192, %s36_s28, [#allocation6], %s1547_s9, %s1547_s9, %s1548_s10  }
   0x7   :  { %s22_s12 = sshll.u32 %s1549_s11, 4  ;;  %s1550_s1 = smov 512   ;;  %s23_s12 = int_to_ptr.vmem [resolvable:$true] %s22_s12 }
   0x8   :  { %s1551_s13 = smov 32   ;;  %s48_s16 = sshll.u32 %s1634_s3, 4  ;;  %s49_s16 = int_to_ptr.hbm [resolvable:$true] %s48_s16 }
   0x9   :  { %28 = dma.hbm_to_vmem [thread:$0]  %s21_s8, 1024, %s23_s12, [#allocation3], %s1550_s1, %s1550_s1, %s1551_s13  }
   0xa   :  { %s1552_s17 = smov [#allocation7]   ;;  %s63_s20 = sshll.u32 %s1636_s5, 4  ;;  %s64_s20 = int_to_ptr.hbm [resolvable:$true] %s63_s20 }
   0xb   :  { %s50_s0 = sshll.u32 %s1552_s17, 4  ;;  %s1553_s21 = smov [#allocation8]   ;;  %s51_s0 = int_to_ptr.vmem [resolvable:$true] %s50_s0 }
   0xc   :  { %56 = dma.hbm_to_vmem [thread:$0]  %s49_s16, 1024, %s51_s0, [#allocation6], %s1547_s9, %s1547_s9, %s1548_s10  }
   0xd   :  { %s65_s22 = sshll.u32 %s1553_s21, 4  ;;  %s66_s22 = int_to_ptr.vmem [resolvable:$true] %s65_s22 }
   0xe   :  { %71 = dma.hbm_to_vmem [thread:$0]  %s64_s20, 1024, %s66_s22, [#allocation9], %s1547_s9, %s1547_s9, %s1548_s10  }
   0xf   :  { %1538 = dma.done.wait [#allocation3], 1024  }
  0x10   :  { %1539 = vsyncadd [#allocation3], 4294966272 }
  0x11   :  { %1540 = dma.done.wait [#allocation6], 9216  }
  0x12   :  { %1541 = vsyncadd [#allocation6], 4294958080 }
  0x13   :  { %1542 = dma.done.wait [#allocation9], 1024  }
  0x14   :  { %1543 = vsyncadd [#allocation9], 4294966272  ;;  %v1328_v0 = vld [vmem:[#allocation5 + $0x38] sm:$0xff]  ;;  %v1327_v4 = vld [vmem:[#allocation5 + $0x30] sm:$0xff]  ;;  %s1554_s26 = smov [#allocation10]   ;;  %s946_s30 = sshll.u32 %s1638_s7, 4  ;;  %s947_s30 = int_to_ptr.hbm [resolvable:$true] %s946_s30 }
  0x15   :  { %v1336_v1 = vld [vmem:[#allocation5 + $0x78] sm:$0xff]  ;;  %654 = vmatpush.bf16.msra.mxu0 %v1328_v0  ;;  %v1335_v5 = vld [vmem:[#allocation5 + $0x70] sm:$0xff]  ;;  %v1326_v8 = vld [vmem:[#allocation5 + $0x28] sm:$0xff]  ;;  %s944_s27 = sshll.u32 %s1554_s26, 4  ;;  %s945_s27 = int_to_ptr.vmem [resolvable:$true] %s944_s27 }
  0x16   :  { %v1344_v2 = vld [vmem:[#allocation5 + $0xb8] sm:$0xff]  ;;  %668 = vmatpush.bf16.msra.mxu1 %v1336_v1  ;;  %v1343_v6 = vld [vmem:[#allocation5 + $0xb0] sm:$0xff]  ;;  %v1334_v9 = vld [vmem:[#allocation5 + $0x68] sm:$0xff] }
  0x17   :  { %v1352_v3 = vld [vmem:[#allocation5 + $0xf8] sm:$0xff]  ;;  %682 = vmatpush.bf16.msra.mxu2 %v1344_v2  ;;  %v1351_v7 = vld [vmem:[#allocation5 + $0xf0] sm:$0xff]  ;;  %v1342_v10 = vld [vmem:[#allocation5 + $0xa8] sm:$0xff] }
  0x18   :  { %696 = vmatpush.bf16.msra.mxu3 %v1352_v3  ;;  %v1350_v11 = vld [vmem:[#allocation5 + $0xe8] sm:$0xff]  ;;  %v1325_v12 = vld [vmem:[#allocation5 + $0x20] sm:$0xff]  ;;  %v1324_v16 = vld [vmem:[#allocation5 + $0x18] sm:$0xff] }
  0x19   :  { %655 = vmatpush.bf16.msra.mxu0 %v1327_v4  ;;  %v1333_v13 = vld [vmem:[#allocation5 + $0x60] sm:$0xff]  ;;  %v1332_v17 = vld [vmem:[#allocation5 + $0x58] sm:$0xff]  ;;  %v1323_v20 = vld [vmem:[#allocation5 + $0x10] sm:$0xff] }
  0x1a   :  { %669 = vmatpush.bf16.msra.mxu1 %v1335_v5  ;;  %v1341_v14 = vld [vmem:[#allocation5 + $0xa0] sm:$0xff]  ;;  %v1340_v18 = vld [vmem:[#allocation5 + $0x98] sm:$0xff]  ;;  %v1331_v21 = vld [vmem:[#allocation5 + $0x50] sm:$0xff] }
  0x1b   :  { %683 = vmatpush.bf16.msra.mxu2 %v1343_v6  ;;  %v1349_v15 = vld [vmem:[#allocation5 + $0xe0] sm:$0xff]  ;;  %v1348_v19 = vld [vmem:[#allocation5 + $0xd8] sm:$0xff]  ;;  %v1339_v22 = vld [vmem:[#allocation5 + $0x90] sm:$0xff] }
  0x1c   :  { %697 = vmatpush.bf16.msra.mxu3 %v1351_v7  ;;  %v1347_v23 = vld [vmem:[#allocation5 + $0xd0] sm:$0xff]  ;;  %v1322_v24 = vld [vmem:[#allocation5 + $0x8] sm:$0xff]  ;;  %v1321_v28 = vld [vmem:[#allocation5] sm:$0xff] }
  0x1d   :  { %656 = vmatpush.bf16.msra.mxu0 %v1326_v8  ;;  %v1330_v25 = vld [vmem:[#allocation5 + $0x48] sm:$0xff]  ;;  %v1329_v29 = vld [vmem:[#allocation5 + $0x40] sm:$0xff]  ;;  %v1360_v32 = vld [vmem:[#allocation5 + $0x138] sm:$0xff] }
  0x1e   :  { %670 = vmatpush.bf16.msra.mxu1 %v1334_v9  ;;  %v1338_v26 = vld [vmem:[#allocation5 + $0x88] sm:$0xff]  ;;  %v1337_v30 = vld [vmem:[#allocation5 + $0x80] sm:$0xff]  ;;  %v1368_v33 = vld [vmem:[#allocation5 + $0x178] sm:$0xff] }
  0x1f   :  { %684 = vmatpush.bf16.msra.mxu2 %v1342_v10  ;;  %v1346_v27 = vld [vmem:[#allocation5 + $0xc8] sm:$0xff]  ;;  %v1345_v31 = vld [vmem:[#allocation5 + $0xc0] sm:$0xff]  ;;  %v1376_v42 = vld [vmem:[#allocation5 + $0x1b8] sm:$0xff] }
  0x20   :  { %698 = vmatpush.bf16.msra.mxu3 %v1350_v11  ;;  %v971_v34 = vld [vmem:[#allocation2 + $0x8] sm:$0xf]  ;;  %v963_v36 = vld [vmem:[#allocation2] sm:$0xf]  ;;  %v1314_v38 = vld [vmem:[#allocation2 + $0xc] sm:$0xf] }
  0x21   :  { %657 = vmatpush.bf16.msra.mxu0 %v1325_v12  ;;  %v1318_v35 = vld [vmem:[#allocation2 + $0x24] sm:$0xf0]  ;;  %v1317_v37 = vld [vmem:[#allocation2 + $0x1c] sm:$0xf0]  ;;  %v973_v39 = vld [vmem:[#allocation2 + $0x28] sm:$0xf0] }
  0x22   :  { %671 = vmatpush.bf16.msra.mxu1 %v1333_v13  ;;  %v1313_v40 = vld [vmem:[#allocation2 + $0x4] sm:$0xf]  ;;  %v1384_v43 = vld [vmem:[#allocation5 + $0x1f8] sm:$0xff]  ;;  %v972_v44 = vor.u32 %v1318_v35, %v971_v34  ;;  %v964_v45 = vor.u32 %v1317_v37, %v963_v36  ;;  %v976_v46 = vor.u32 %v1314_v38, %v973_v39  ;;  %v1359_v48 = vld [vmem:[#allocation5 + $0x130] sm:$0xff] }
  0x23   :  { %685 = vmatpush.bf16.msra.mxu2 %v1341_v14  ;;  %v965_v41 = vld [vmem:[#allocation2 + $0x20] sm:$0xf0]  ;;  %v1367_v49 = vld [vmem:[#allocation5 + $0x170] sm:$0xff]  ;;  %v1358_v52 = vld [vmem:[#allocation5 + $0x128] sm:$0xff] }
  0x24   :  { %699 = vmatpush.bf16.msra.mxu3 %v1349_v15  ;;  %v968_v47 = vor.u32 %v1313_v40, %v965_v41  ;;  %v1375_v50 = vld [vmem:[#allocation5 + $0x1b0] sm:$0xff]  ;;  %v1366_v53 = vld [vmem:[#allocation5 + $0x168] sm:$0xff]  ;;  %v1357_v56 = vld [vmem:[#allocation5 + $0x120] sm:$0xff] }
  0x25   :  { %658 = vmatpush.bf16.msra.mxu0 %v1324_v16  ;;  %v1383_v51 = vld [vmem:[#allocation5 + $0x1f0] sm:$0xff]  ;;  %v1374_v54 = vld [vmem:[#allocation5 + $0x1a8] sm:$0xff]  ;;  %v1365_v57 = vld [vmem:[#allocation5 + $0x160] sm:$0xff] }
  0x26   :  { %672 = vmatpush.bf16.msra.mxu1 %v1332_v17  ;;  %v1382_v55 = vld [vmem:[#allocation5 + $0x1e8] sm:$0xff]  ;;  %v1373_v58 = vld [vmem:[#allocation5 + $0x1a0] sm:$0xff]  ;;  %v1356_v60 = vld [vmem:[#allocation5 + $0x118] sm:$0xff] }
  0x27   :  { %686 = vmatpush.bf16.msra.mxu2 %v1340_v18  ;;  %v1381_v59 = vld [vmem:[#allocation5 + $0x1e0] sm:$0xff]  ;;  %v1364_v61 = vld [vmem:[#allocation5 + $0x158] sm:$0xff]  ;;  %v1355_v0 = vld [vmem:[#allocation5 + $0x110] sm:$0xff] }
  0x28   :  { %700 = vmatpush.bf16.msra.mxu3 %v1348_v19  ;;  %v1372_v62 = vld [vmem:[#allocation5 + $0x198] sm:$0xff]  ;;  %v1363_v1 = vld [vmem:[#allocation5 + $0x150] sm:$0xff]  ;;  %v1354_v4 = vld [vmem:[#allocation5 + $0x108] sm:$0xff] }
  0x29   :  { %659 = vmatpush.bf16.msra.mxu0 %v1323_v20  ;;  %v1380_v63 = vld [vmem:[#allocation5 + $0x1d8] sm:$0xff]  ;;  %v1371_v2 = vld [vmem:[#allocation5 + $0x190] sm:$0xff]  ;;  %v1362_v5 = vld [vmem:[#allocation5 + $0x148] sm:$0xff] }
  0x2a   :  { %673 = vmatpush.bf16.msra.mxu1 %v1331_v21  ;;  %v1379_v3 = vld [vmem:[#allocation5 + $0x1d0] sm:$0xff]  ;;  %v1370_v6 = vld [vmem:[#allocation5 + $0x188] sm:$0xff]  ;;  %v1353_v8 = vld [vmem:[#allocation5 + $0x100] sm:$0xff] }
  0x2b   :  { %687 = vmatpush.bf16.msra.mxu2 %v1339_v22  ;;  %v1378_v7 = vld [vmem:[#allocation5 + $0x1c8] sm:$0xff]  ;;  %v1361_v9 = vld [vmem:[#allocation5 + $0x140] sm:$0xff]  ;;  %v979_v12 = vld [vmem:[#allocation2 + $0x10] sm:$0xf] }
  0x2c   :  { %701 = vmatpush.bf16.msra.mxu3 %v1347_v23  ;;  %v1369_v10 = vld [vmem:[#allocation5 + $0x180] sm:$0xff]  ;;  %v1319_v13 = vld [vmem:[#allocation2 + $0x2c] sm:$0xf0]  ;;  %v1315_v14 = vld [vmem:[#allocation2 + $0x14] sm:$0xf] }
  0x2d   :  { %660 = vmatpush.bf16.msra.mxu0 %v1322_v24  ;;  %v1377_v11 = vld [vmem:[#allocation5 + $0x1c0] sm:$0xff]  ;;  %v981_v15 = vld [vmem:[#allocation2 + $0x30] sm:$0xf0]  ;;  %v987_v16 = vld [vmem:[#allocation2 + $0x18] sm:$0xf]  ;;  %v980_v20 = vor.u32 %v1319_v13, %v979_v12 }
  0x2e   :  { %674 = vmatpush.bf16.msra.mxu1 %v1330_v25  ;;  %v1320_v17 = vld [vmem:[#allocation2 + $0x34] sm:$0xf0]  ;;  %v1316_v18 = vld [vmem:[#allocation2 + $0x1c] sm:$0xf]  ;;  %v984_v21 = vor.u32 %v1315_v14, %v981_v15  ;;  %v1391_v25 = vld [vmem:[#allocation7 + $0x30] sm:$0xff] }
  0x2f   :  { %688 = vmatpush.bf16.msra.mxu2 %v1338_v26  ;;  %v989_v19 = vld [vmem:[#allocation2 + $0x38] sm:$0xf0]  ;;  %v988_v22 = vor.u32 %v1320_v17, %v987_v16  ;;  %v1390_v26 = vld [vmem:[#allocation7 + $0x28] sm:$0xff]  ;;  %v1415_v34 = vld [vmem:[%s1633_s2] ss:$0 sm:$0xff] }
  0x30   :  { %702 = vmatpush.bf16.msra.mxu3 %v1346_v27  ;;  %v992_v23 = vor.u32 %v1316_v18, %v989_v19  ;;  %v1392_v24 = vld [vmem:[#allocation7 + $0x38] sm:$0xff]  ;;  %v1389_v27 = vld [vmem:[#allocation7 + $0x20] sm:$0xff]  ;;  %v1399_v40 = vld [vmem:[#allocation8 + $0x30] sm:$0xff] }
  0x31   :  { %661 = vmatpush.bf16.msra.mxu0 %v1321_v28  ;;  %v1388_v28 = vld [vmem:[#allocation7 + $0x18] sm:$0xff]  ;;  %v1416_v13 = vld [vmem:[%s1635_s4] ss:$0 sm:$0xff] }
  0x32   :  { %675 = vmatpush.bf16.msra.mxu1 %v1329_v29  ;;  %v1387_v29 = vld [vmem:[#allocation7 + $0x10] sm:$0xff]  ;;  %v1400_v39 = vld [vmem:[#allocation8 + $0x38] sm:$0xff] }
  0x33   :  { %689 = vmatpush.bf16.msra.mxu2 %v1337_v30 }
  0x34   :  { %703 = vmatpush.bf16.msra.mxu3 %v1345_v31  ;;  %662 = vmatmul.bf16.vlgmr.msra.gmra.mxu0 %v964_v45  ;;  %v1386_v31 = vld [vmem:[#allocation7 + $0x8] sm:$0xff] }
  0x35   :  { %710 = vmatpush.bf16.msrb.mxu0 %v1360_v32  ;;  %676 = vmatmul.bf16.vlgmr.msra.gmra.mxu1 %v968_v47 }
  0x36   :  { %724 = vmatpush.bf16.msrb.mxu1 %v1368_v33  ;;  %690 = vmatmul.bf16.vlgmr.msra.gmra.mxu2 %v972_v44  ;;  %v1385_v33 = vld [vmem:[#allocation7] sm:$0xff]  ;;  %v1398_v44 = vld [vmem:[#allocation8 + $0x28] sm:$0xff] }
  0x37   :  { %738 = vmatpush.bf16.msrb.mxu2 %v1376_v42  ;;  %704 = vmatmul.bf16.vlgmr.msra.gmra.mxu3 %v976_v46 }
  0x38   :  { %752 = vmatpush.bf16.msrb.mxu3 %v1384_v43 }
  0x39   :  { %711 = vmatpush.bf16.msrb.mxu0 %v1359_v48 }
  0x3a   :  { %725 = vmatpush.bf16.msrb.mxu1 %v1367_v49 }
  0x3b   :  { %739 = vmatpush.bf16.msrb.mxu2 %v1375_v50  ;;  %v1397_v50 = vld [vmem:[#allocation8 + $0x20] sm:$0xff] }
  0x3c   :  { %753 = vmatpush.bf16.msrb.mxu3 %v1383_v51 }
  0x3d   :  { %712 = vmatpush.bf16.msrb.mxu0 %v1358_v52 }
  0x3e   :  { %726 = vmatpush.bf16.msrb.mxu1 %v1366_v53 }
  0x3f   :  { %740 = vmatpush.bf16.msrb.mxu2 %v1374_v54 }
  0x40   :  { %754 = vmatpush.bf16.msrb.mxu3 %v1382_v55 }
  0x41   :  { %713 = vmatpush.bf16.msrb.mxu0 %v1357_v56 }
  0x42   :  { %727 = vmatpush.bf16.msrb.mxu1 %v1365_v57 }
  0x43   :  { %741 = vmatpush.bf16.msrb.mxu2 %v1373_v58 }
  0x44   :  { %755 = vmatpush.bf16.msrb.mxu3 %v1381_v59 }
  0x45   :  { %714 = vmatpush.bf16.msrb.mxu0 %v1356_v60 }
  0x46   :  { %728 = vmatpush.bf16.msrb.mxu1 %v1364_v61 }
  0x47   :  { %742 = vmatpush.bf16.msrb.mxu2 %v1372_v62 }
  0x48   :  { %756 = vmatpush.bf16.msrb.mxu3 %v1380_v63 }
  0x49   :  { %715 = vmatpush.bf16.msrb.mxu0 %v1355_v0 }
  0x4a   :  { %729 = vmatpush.bf16.msrb.mxu1 %v1363_v1 }
  0x4b   :  { %743 = vmatpush.bf16.msrb.mxu2 %v1371_v2 }
  0x4c   :  { %757 = vmatpush.bf16.msrb.mxu3 %v1379_v3 }
  0x4d   :  { %716 = vmatpush.bf16.msrb.mxu0 %v1354_v4 }
  0x4e   :  { %730 = vmatpush.bf16.msrb.mxu1 %v1362_v5 }
  0x4f   :  { %744 = vmatpush.bf16.msrb.mxu2 %v1370_v6 }
  0x50   :  { %758 = vmatpush.bf16.msrb.mxu3 %v1378_v7 }
  0x51   :  { %717 = vmatpush.bf16.msrb.mxu0 %v1353_v8  ;;  %v1396_v8 = vld [vmem:[#allocation8 + $0x18] sm:$0xff] }
  0x52   :  { %731 = vmatpush.bf16.msrb.mxu1 %v1361_v9  ;;  %v1395_v9 = vld [vmem:[#allocation8 + $0x10] sm:$0xff] }
  0x53   :  { %745 = vmatpush.bf16.msrb.mxu2 %v1369_v10  ;;  %v1394_v10 = vld [vmem:[#allocation8 + $0x8] sm:$0xff] }
  0x54   :  { %759 = vmatpush.bf16.msrb.mxu3 %v1377_v11  ;;  %718 = vmatmul.bf16.vlgmr.msrb.gmra.mxu0 %v980_v20  ;;  %v1393_v11 = vld [vmem:[#allocation8] sm:$0xff] }
  0x55   :  { %732 = vmatmul.bf16.vlgmr.msrb.gmra.mxu1 %v984_v21  ;;  %837 = vmatpush.bf16.msra.mxu0 %v1392_v24  ;;  %v1417_v21 = vld [vmem:[%s1637_s6] ss:$0 sm:$0xff] }
  0x56   :  { %746 = vmatmul.bf16.vlgmr.msrb.gmra.mxu2 %v988_v22  ;;  %922 = vmatpush.bf16.msra.mxu1 %v1400_v39 }
  0x57   :  { %760 = vmatmul.bf16.vlgmr.msrb.gmra.mxu3 %v992_v23 }
  0x59   :  { %838 = vmatpush.bf16.msra.mxu0 %v1391_v25 }
  0x5a   :  { %923 = vmatpush.bf16.msra.mxu1 %v1399_v40 }
  0x5d   :  { %839 = vmatpush.bf16.msra.mxu0 %v1390_v26 }
  0x5e   :  { %924 = vmatpush.bf16.msra.mxu1 %v1398_v44 }
  0x61   :  { %840 = vmatpush.bf16.msra.mxu0 %v1389_v27 }
  0x62   :  { %925 = vmatpush.bf16.msra.mxu1 %v1397_v50 }
  0x65   :  { %841 = vmatpush.bf16.msra.mxu0 %v1388_v28 }
  0x66   :  { %926 = vmatpush.bf16.msra.mxu1 %v1396_v8 }
  0x69   :  { %842 = vmatpush.bf16.msra.mxu0 %v1387_v29 }
  0x6a   :  { %927 = vmatpush.bf16.msra.mxu1 %v1395_v9 }
  0x6d   :  { %843 = vmatpush.bf16.msra.mxu0 %v1386_v31 }
  0x6e   :  { %928 = vmatpush.bf16.msra.mxu1 %v1394_v10 }
  0x71   :  { %844 = vmatpush.bf16.msra.mxu0 %v1385_v33 }
  0x72   :  { %929 = vmatpush.bf16.msra.mxu1 %v1393_v11 }
  0xb1   :  { %v663_v30 = vpop.f32.mrf.mxu0 }
  0xb2   :  { %v677_v32 = vpop.f32.mrf.mxu1  ;;  %v664_v37 = vadd.f32 %v1415_v34, %v663_v30 }
  0xb4   :  { %v678_v42 = vadd.f32 %v677_v32, %v664_v37 }
  0xb9   :  { %v691_v35 = vpop.f32.mrf.mxu2  ;;  %v665_v38 = vpop.f32.mrf.mxu0 }
  0xba   :  { %v705_v36 = vpop.f32.mrf.mxu3  ;;  %v679_v41 = vpop.f32.mrf.mxu1  ;;  %v666_v43 = vadd.f32 %v1415_v34, %v665_v38  ;;  %v692_v47 = vadd.f32 %v691_v35, %v678_v42 }
  0xbc   :  { %v680_v48 = vadd.f32 %v679_v41, %v666_v43  ;;  %v706_v52 = vadd.f32 %v705_v36, %v692_v47 }
  0xc1   :  { %v693_v45 = vpop.f32.mrf.mxu2 }
  0xc2   :  { %v707_v46 = vpop.f32.mrf.mxu3  ;;  %v694_v53 = vadd.f32 %v693_v45, %v680_v48 }
  0xc4   :  { %v708_v57 = vadd.f32 %v707_v46, %v694_v53 }
  0xd1   :  { %v719_v49 = vpop.f32.mrf.mxu0 }
  0xd2   :  { %v733_v51 = vpop.f32.mrf.mxu1  ;;  %v720_v54 = vadd.f32 %v719_v49, %v706_v52 }
  0xd4   :  { %v734_v59 = vadd.f32 %v733_v51, %v720_v54 }
  0xd9   :  { %v747_v55 = vpop.f32.mrf.mxu2  ;;  %v721_v58 = vpop.f32.mrf.mxu0 }
  0xda   :  { %v761_v56 = vpop.f32.mrf.mxu3  ;;  %v722_v60 = vadd.f32 %v721_v58, %v708_v57  ;;  %v748_v61 = vadd.f32 %v747_v55, %v734_v59  ;;  %v735_v62 = vpop.f32.mrf.mxu1 }
  0xdc   :  { %v736_v63 = vadd.f32 %v735_v62, %v722_v60  ;;  %v762_v1 = vadd.f32 %v761_v56, %v748_v61 }
  0xde   :  { %v766_v5 = vmax.f32 %v762_v1, 0.0 }
  0xe1   :  { %v749_v0 = vpop.f32.mrf.mxu2 }
  0xe2   :  { %v750_v2 = vadd.f32 %v749_v0, %v736_v63  ;;  %v763_v3 = vpop.f32.mrf.mxu3 }
  0xe4   :  { %v764_v4 = vadd.f32 %v763_v3, %v750_v2 }
  0xe6   :  { %v767_v6 = vmax.f32 %v764_v4, 0.0 }
  0xe8   :  { %v768_v7 = vpack.c.bf16 %v767_v6, %v766_v5 }
  0xea   :  { %845 = vmatmul.bf16.vlgmr.msra.gmra.mxu0 %v768_v7 }
 0x167   :  { %v846_v12 = vpop.f32.mrf.mxu0 }
 0x168   :  { %v847_v14 = vadd.f32 %v1416_v13, %v846_v12 }
 0x16a   :  { %v851_v17 = vmax.f32 %v847_v14, 0.0 }
 0x16f   :  { %v848_v15 = vpop.f32.mrf.mxu0 }
 0x170   :  { %v849_v16 = vadd.f32 %v1416_v13, %v848_v15 }
 0x172   :  { %v852_v18 = vmax.f32 %v849_v16, 0.0 }
 0x174   :  { %v853_v19 = vpack.c.bf16 %v852_v18, %v851_v17 }
 0x176   :  { %930 = vmatmul.bf16.vlgmr.msra.gmra.mxu1 %v853_v19 }
 0x1f3   :  { %v931_v20 = vpop.f32.mrf.mxu1 }
 0x1f4   :  { %v932_v23 = vadd.f32 %v1417_v21, %v931_v20 }
 0x1fb   :  { %v933_v22 = vpop.f32.mrf.mxu1 }
 0x1fc   :  { %v934_v24 = vadd.f32 %v1417_v21, %v933_v22 }
 0x1fe   :  { %v1404_v25 = vpack.c.bf16 %v934_v24, %v932_v23 }
 0x200   :  { %1405 = vst [vmem:[#allocation10] sm:$0xff] %v1404_v25  }
 0x201   :  { %952 = dma.vmem_to_hbm [thread:$0]  %s945_s27, 128, %s947_s30, [#allocation4], %s1547_s9, %s1547_s9, %s1548_s10  }
 0x202   :  { %1544 = dma.done.wait [#allocation4], 128  }
 0x203   :  { %1545 = vsyncadd [#allocation4], 4294967168 }
 0x204   :  { %957 = vsyncpa [#allocation3], 1 }
 0x205   :  { %958 = vsyncpa [#allocation6], 1 }
 0x206   :  { %959 = vsyncpa [#allocation9], 1 }
 0x207   :  { %960 = vsyncpa [#allocation4], 1 }

</bundles_post_ra>
